<compile_context>
chip_gen: v6e
topology: v6e:2x2x1
jax: 0.10.0
libtpu: 0.0.40
codegen_flags: <defaults>
</compile_context>

<pallas_src>
import jax
import jax.numpy as jnp
from jax.experimental import pallas as pl
from jax.experimental.pallas import tpu as pltpu

_LANE = 128


def _round_up(n, m):
    return (n + m - 1) // m * m


def mlp_logsoftmax_kernel(xT_ref, w1_ref, b1_ref, w2_ref, b2_ref,
                          w3_ref, b3_ref, o_ref):
    """Transposed MLP: activations are (features, tile_b), batch on lanes."""
    # fc1 + ReLU (dropout == identity in eval mode). bf16 MXU, f32 accumulate.
    h1 = jnp.dot(w1_ref[...], xT_ref[...],
                 preferred_element_type=jnp.float32) + b1_ref[...]
    h1 = jnp.maximum(h1, 0.0)

    # fc2 + ReLU (elementwise stays f32; only matmul operands drop to bf16).
    h2 = jnp.dot(w2_ref[...], h1.astype(w2_ref.dtype),
                 preferred_element_type=jnp.float32) + b2_ref[...]
    h2 = jnp.maximum(h2, 0.0)

    # fc3
    logits = jnp.dot(w3_ref[...], h2.astype(w3_ref.dtype),
                     preferred_element_type=jnp.float32) + b3_ref[...]

    # LogSoftmax over the class axis (axis 0 in the transposed layout),
    # numerically stable, all f32.
    m = jnp.max(logits, axis=0, keepdims=True)
    shifted = logits - m
    lse = jnp.log(jnp.sum(jnp.exp(shifted), axis=0, keepdims=True))
    o_ref[...] = (shifted - lse).astype(o_ref.dtype)


def _vmem_budget_bytes(tile_b, in_c, c1, c2, out_c):
    x_tiles = 2 * tile_b * in_c * 2            # double-buffered bf16 x^T tile
    o_tiles = 2 * tile_b * out_c * 4           # double-buffered f32 out tile
    weights = 2 * ((in_c * c1 + c1 * c2 + c2 * out_c) * 2
                   + (c1 + c2 + out_c) * 4)    # resident weights/biases (x2 bufs)
    acts = 2 * tile_b * (c1 + c2) * 4          # intermediate activation headroom
    return x_tiles + o_tiles + weights + acts


def multiclass_net_forward(x, params, *, tile_b=None):
    """x: [B, input_channel]. params: dict of f32 weights/biases.

    Eval-mode forward (dropout == identity). Matmul operands are cast to bf16;
    accumulation / bias / log-softmax are f32; output is f32 log-probs.
    """
    # Transposed (feature-major) weights so the batch dim lands on MXU lanes.
    w1t = params["w1"].T.astype(jnp.bfloat16)          # (c1, in_c)
    w2t = params["w2"].T.astype(jnp.bfloat16)          # (c2, c1)
    w3t = params["w3"].T.astype(jnp.bfloat16)          # (out_c, c2)
    b1c = params["b1"].reshape(-1, 1).astype(jnp.float32)   # (c1, 1)
    b2c = params["b2"].reshape(-1, 1).astype(jnp.float32)   # (c2, 1)
    b3c = params["b3"].reshape(-1, 1).astype(jnp.float32)   # (out_c, 1)

    B, in_c = x.shape
    c1 = w1t.shape[0]
    c2 = w2t.shape[0]
    out_c = w3t.shape[0]

    # Batch tile: lane-multiple (128), large cap (8192) to amortize per-step
    # overhead, but default to ~B/2 so there are >= 2 grid steps (keeps v7x's
    # second TensorCore busy under "parallel" semantics).
    TILE_B_MAX = 8192
    if tile_b is None:
        tile_b = min(TILE_B_MAX, max(_LANE, _round_up((B + 1) // 2, _LANE)))
    tile_b = max(_LANE, _round_up(tile_b, _LANE))

    B_pad = _round_up(B, tile_b)
    xT = x.astype(jnp.bfloat16).T                       # (in_c, B)
    if B_pad != B:
        xT = jnp.pad(xT, ((0, 0), (0, B_pad - B)))

    grid = (B_pad // tile_b,)
    const = lambda i: (0, 0)                            # resident across grid

    flops = 2 * B_pad * (in_c * c1 + c1 * c2 + c2 * out_c)
    transcendentals = B_pad * (out_c + 1)               # exp per class + log per row
    bytes_accessed = (B_pad * in_c * 2 + B_pad * out_c * 4
                      + (in_c * c1 + c1 * c2 + c2 * out_c) * 2
                      + (c1 + c2 + out_c) * 4)

    vmem_limit = int(min(max(2 * _vmem_budget_bytes(tile_b, in_c, c1, c2, out_c),
                             16 * 1024 * 1024),
                         48 * 1024 * 1024))

    out_t = pl.pallas_call(
        mlp_logsoftmax_kernel,
        out_shape=jax.ShapeDtypeStruct((out_c, B_pad), jnp.float32),
        grid=grid,
        in_specs=[
            pl.BlockSpec((in_c, tile_b), lambda i: (0, i)),   # x^T tile
            pl.BlockSpec((c1, in_c), const),                  # w1^T
            pl.BlockSpec((c1, 1), const),                     # b1 (column)
            pl.BlockSpec((c2, c1), const),                    # w2^T
            pl.BlockSpec((c2, 1), const),                     # b2
            pl.BlockSpec((out_c, c2), const),                 # w3^T
            pl.BlockSpec((out_c, 1), const),                  # b3
        ],
        out_specs=pl.BlockSpec((out_c, tile_b), lambda i: (0, i)),
        compiler_params=pltpu.CompilerParams(
            dimension_semantics=("parallel",),                # both TCs on v7x
            vmem_limit_bytes=vmem_limit,
        ),
        cost_estimate=pl.CostEstimate(
            flops=flops,
            transcendentals=transcendentals,
            bytes_accessed=bytes_accessed,
        ),
    )(xT, w1t, b1c, w2t, b2c, w3t, b3c)

    out = out_t[:, :B].T if B_pad != B else out_t.T
    return out


def init_params(key, input_channel, output_channel, channel_list=None):
    if channel_list is None:
        channel_list = [input_channel * 2, output_channel * 2]
    c1, c2 = channel_list
    ks = jax.random.split(key, 6)

    def linear_init(kw, kb, fan_in, fan_out):
        # Mirror torch.nn.Linear default init: U(-1/sqrt(fan_in), 1/sqrt(fan_in))
        bound = 1.0 / jnp.sqrt(jnp.float32(fan_in))
        w = jax.random.uniform(kw, (fan_in, fan_out), jnp.float32, -bound, bound)
        b = jax.random.uniform(kb, (1, fan_out), jnp.float32, -bound, bound)
        return w, b

    w1, b1 = linear_init(ks[0], ks[1], input_channel, c1)
    w2, b2 = linear_init(ks[2], ks[3], c1, c2)
    w3, b3 = linear_init(ks[4], ks[5], c2, output_channel)
    return {"w1": w1, "b1": b1, "w2": w2, "b2": b2, "w3": w3, "b3": b3}


if __name__ == "__main__":
    key = jax.random.PRNGKey(0)
    k_x, k_p = jax.random.split(key)

    batch = 300               # non-multiple of the tile -> exercises padding path
    input_channel = 16
    output_channel = 8        # channel_list defaults to [32, 16]

    x = jax.random.normal(k_x, (batch, input_channel), jnp.float32)
    params = init_params(k_p, input_channel, output_channel)

    # Default tile_b -> 256 here, so grid=(2,): exercises the multi-tile
    # pipelined path and the padded tail (300 -> 512 rows).
    out = multiclass_net_forward(x, params)
    out = jax.block_until_ready(out)

    # Pure-JAX reference with identical bf16 casts (eval-mode dropout == identity).
    def ref(x, p):
        xb = x.astype(jnp.bfloat16)
        h = jnp.dot(xb, p["w1"].astype(jnp.bfloat16),
                    preferred_element_type=jnp.float32) + p["b1"]
        h = jnp.maximum(h, 0.0)
        h = jnp.dot(h.astype(jnp.bfloat16), p["w2"].astype(jnp.bfloat16),
                    preferred_element_type=jnp.float32) + p["b2"]
        h = jnp.maximum(h, 0.0)
        logits = jnp.dot(h.astype(jnp.bfloat16), p["w3"].astype(jnp.bfloat16),
                         preferred_element_type=jnp.float32) + p["b3"]
        return jax.nn.log_softmax(logits, axis=1)

    expected = ref(x, params)
    assert out.shape == (batch, output_channel)
    assert jnp.allclose(out, expected, atol=2e-3, rtol=2e-3), \
        float(jnp.max(jnp.abs(out - expected)))
    # log-softmax rows must sum (in prob space) to 1
    assert jnp.allclose(jnp.sum(jnp.exp(out), axis=1), 1.0, atol=1e-4)

    print("KERNEL_OK")
</pallas_src>

<mosaic_0001>
module attributes {stable_mosaic.version = 11 : i64} {
  func.func @mlp_logsoftmax_kernel(%arg0: i32, %arg1: memref<16x256xbf16, #tpu.memory_space<vmem>>, %arg2: memref<32x16xbf16, #tpu.memory_space<vmem>>, %arg3: memref<32x1xf32, #tpu.memory_space<vmem>>, %arg4: memref<16x32xbf16, #tpu.memory_space<vmem>>, %arg5: memref<16x1xf32, #tpu.memory_space<vmem>>, %arg6: memref<8x16xbf16, #tpu.memory_space<vmem>>, %arg7: memref<8x1xf32, #tpu.memory_space<vmem>>, %arg8: memref<8x256xf32, #tpu.memory_space<vmem>>) attributes {dimension_semantics = [#tpu.dimension_semantics<parallel>], iteration_bounds = array<i64: 2>, scalar_prefetch = 0 : i64, scratch_operands = 0 : i64, tpu.core_type = #tpu.core_type<tc>, window_params = [{transform_indices = @transform_0, window_bounds = array<i64: 16, 256>}, {pipeline_mode = #tpu.pipeline_mode<synchronous>, transform_indices = @transform_1, window_bounds = array<i64: 32, 16>}, {pipeline_mode = #tpu.pipeline_mode<synchronous>, transform_indices = @transform_2, window_bounds = array<i64: 32, 1>}, {pipeline_mode = #tpu.pipeline_mode<synchronous>, transform_indices = @transform_3, window_bounds = array<i64: 16, 32>}, {pipeline_mode = #tpu.pipeline_mode<synchronous>, transform_indices = @transform_4, window_bounds = array<i64: 16, 1>}, {pipeline_mode = #tpu.pipeline_mode<synchronous>, transform_indices = @transform_5, window_bounds = array<i64: 8, 16>}, {pipeline_mode = #tpu.pipeline_mode<synchronous>, transform_indices = @transform_6, window_bounds = array<i64: 8, 1>}, {transform_indices = @transform_7, window_bounds = array<i64: 8, 256>}]} {
    %c0 = arith.constant 0 : index
    %c0_0 = arith.constant 0 : index
    %0 = vector.load %arg2[%c0, %c0_0] : memref<32x16xbf16, #tpu.memory_space<vmem>>, vector<32x16xbf16>
    %c0_1 = arith.constant 0 : index
    %c0_2 = arith.constant 0 : index
    %1 = vector.load %arg1[%c0_1, %c0_2] : memref<16x256xbf16, #tpu.memory_space<vmem>>, vector<16x256xbf16>
    %cst = arith.constant dense<0.000000e+00> : vector<32x256xf32>
    %2 = tpu.matmul %0, %1, %cst {dimension_numbers = #tpu.dot_dimension_numbers<[1], [0], [0], [1], [0, 0, 1, 1], [], []>} : vector<32x16xbf16>, vector<16x256xbf16>, vector<32x256xf32> -> vector<32x256xf32>
    %c0_3 = arith.constant 0 : index
    %c0_4 = arith.constant 0 : index
    %3 = vector.load %arg3[%c0_3, %c0_4] : memref<32x1xf32, #tpu.memory_space<vmem>>, vector<32x1xf32>
    %4 = vector.broadcast %3 : vector<32x1xf32> to vector<32x256xf32>
    %5 = arith.addf %2, %4 : vector<32x256xf32>
    %cst_5 = arith.constant 0.000000e+00 : f32
    %6 = vector.broadcast %cst_5 : f32 to vector<32x256xf32>
    %7 = arith.maximumf %5, %6 : vector<32x256xf32>
    %c0_6 = arith.constant 0 : index
    %c0_7 = arith.constant 0 : index
    %8 = vector.load %arg4[%c0_6, %c0_7] : memref<16x32xbf16, #tpu.memory_space<vmem>>, vector<16x32xbf16>
    %9 = arith.truncf %7 : vector<32x256xf32> to vector<32x256xbf16>
    %cst_8 = arith.constant dense<0.000000e+00> : vector<16x256xf32>
    %10 = tpu.matmul %8, %9, %cst_8 {dimension_numbers = #tpu.dot_dimension_numbers<[1], [0], [0], [1], [0, 0, 1, 1], [], []>} : vector<16x32xbf16>, vector<32x256xbf16>, vector<16x256xf32> -> vector<16x256xf32>
    %c0_9 = arith.constant 0 : index
    %c0_10 = arith.constant 0 : index
    %11 = vector.load %arg5[%c0_9, %c0_10] : memref<16x1xf32, #tpu.memory_space<vmem>>, vector<16x1xf32>
    %12 = vector.broadcast %11 : vector<16x1xf32> to vector<16x256xf32>
    %13 = arith.addf %10, %12 : vector<16x256xf32>
    %cst_11 = arith.constant 0.000000e+00 : f32
    %14 = vector.broadcast %cst_11 : f32 to vector<16x256xf32>
    %15 = arith.maximumf %13, %14 : vector<16x256xf32>
    %c0_12 = arith.constant 0 : index
    %c0_13 = arith.constant 0 : index
    %16 = vector.load %arg6[%c0_12, %c0_13] : memref<8x16xbf16, #tpu.memory_space<vmem>>, vector<8x16xbf16>
    %17 = arith.truncf %15 : vector<16x256xf32> to vector<16x256xbf16>
    %cst_14 = arith.constant dense<0.000000e+00> : vector<8x256xf32>
    %18 = tpu.matmul %16, %17, %cst_14 {dimension_numbers = #tpu.dot_dimension_numbers<[1], [0], [0], [1], [0, 0, 1, 1], [], []>} : vector<8x16xbf16>, vector<16x256xbf16>, vector<8x256xf32> -> vector<8x256xf32>
    %c0_15 = arith.constant 0 : index
    %c0_16 = arith.constant 0 : index
    %19 = vector.load %arg7[%c0_15, %c0_16] : memref<8x1xf32, #tpu.memory_space<vmem>>, vector<8x1xf32>
    %20 = vector.broadcast %19 : vector<8x1xf32> to vector<8x256xf32>
    %21 = arith.addf %18, %20 : vector<8x256xf32>
    %cst_17 = arith.constant dense<0xFF800000> : vector<256xf32>
    %22 = vector.multi_reduction <maximumf>, %21, %cst_17 [0] : vector<8x256xf32> to vector<256xf32>
    %23 = vector.shape_cast %22 : vector<256xf32> to vector<1x256xf32>
    %24 = vector.broadcast %23 : vector<1x256xf32> to vector<8x256xf32>
    %25 = arith.subf %21, %24 : vector<8x256xf32>
    %26 = math.exp %25 : vector<8x256xf32>
    %cst_18 = arith.constant dense<0.000000e+00> : vector<256xf32>
    %27 = vector.multi_reduction <add>, %26, %cst_18 [0] : vector<8x256xf32> to vector<256xf32>
    %28 = vector.shape_cast %27 : vector<256xf32> to vector<1x256xf32>
    %29 = math.log %28 : vector<1x256xf32>
    %30 = vector.broadcast %29 : vector<1x256xf32> to vector<8x256xf32>
    %31 = arith.subf %25, %30 : vector<8x256xf32>
    %c0_19 = arith.constant 0 : index
    %c0_20 = arith.constant 0 : index
    %32 = vector.load %arg8[%c0_19, %c0_20] : memref<8x256xf32, #tpu.memory_space<vmem>>, vector<8x256xf32>
    tpu.vector_store %arg8[%c0_19, %c0_20], %31 {strides = array<i32>} : memref<8x256xf32, #tpu.memory_space<vmem>>, vector<8x256xf32>,
    return
  }
  func.func @transform_0(%arg0: i32) -> (i32, i32) {
    %c0_i32 = arith.constant 0 : i32
    %c0_i32_0 = arith.constant 0 : i32
    return %c0_i32, %arg0 : i32, i32
  }
  func.func @transform_1(%arg0: i32) -> (i32, i32) {
    %c0_i32 = arith.constant 0 : i32
    %c0_i32_0 = arith.constant 0 : i32
    %c0_i32_1 = arith.constant 0 : i32
    return %c0_i32, %c0_i32_0 : i32, i32
  }
  func.func @transform_2(%arg0: i32) -> (i32, i32) {
    %c0_i32 = arith.constant 0 : i32
    %c0_i32_0 = arith.constant 0 : i32
    %c0_i32_1 = arith.constant 0 : i32
    return %c0_i32, %c0_i32_0 : i32, i32
  }
  func.func @transform_3(%arg0: i32) -> (i32, i32) {
    %c0_i32 = arith.constant 0 : i32
    %c0_i32_0 = arith.constant 0 : i32
    %c0_i32_1 = arith.constant 0 : i32
    return %c0_i32, %c0_i32_0 : i32, i32
  }
  func.func @transform_4(%arg0: i32) -> (i32, i32) {
    %c0_i32 = arith.constant 0 : i32
    %c0_i32_0 = arith.constant 0 : i32
    %c0_i32_1 = arith.constant 0 : i32
    return %c0_i32, %c0_i32_0 : i32, i32
  }
  func.func @transform_5(%arg0: i32) -> (i32, i32) {
    %c0_i32 = arith.constant 0 : i32
    %c0_i32_0 = arith.constant 0 : i32
    %c0_i32_1 = arith.constant 0 : i32
    return %c0_i32, %c0_i32_0 : i32, i32
  }
  func.func @transform_6(%arg0: i32) -> (i32, i32) {
    %c0_i32 = arith.constant 0 : i32
    %c0_i32_0 = arith.constant 0 : i32
    %c0_i32_1 = arith.constant 0 : i32
    return %c0_i32, %c0_i32_0 : i32, i32
  }
  func.func @transform_7(%arg0: i32) -> (i32, i32) {
    %c0_i32 = arith.constant 0 : i32
    %c0_i32_0 = arith.constant 0 : i32
    return %c0_i32, %arg0 : i32, i32
  }
}

</mosaic_0001>

<bundles_post_ra>
// kernel: tpu_custom_call.1
= control target key start
LH: loop header
LB: loop body
LE: loop exit
PB: predicated region body
PF: predicated region fallthrough
CT: control target
= control target key end

     0   :  { %12 = vsyncpa [#allocation4], 0  ;;  %s1010_s0 = inlined_call_operand.vmem [shape: bf16[16,512], index: 0, kind: input, shape index: {}]   ;;  %s1011_s1 = inlined_call_operand.vmem [shape: bf16[32,16], index: 1, kind: input, shape index: {}]   ;;  %s1012_s2 = inlined_call_operand.vmem [shape: f32[32,1], index: 2, kind: input, shape index: {}]   ;;  %s1013_s3 = inlined_call_operand.vmem [shape: bf16[16,32], index: 3, kind: input, shape index: {}]   ;;  %s1014_s4 = inlined_call_operand.vmem [shape: f32[16,1], index: 4, kind: input, shape index: {}]   ;;  %s1015_s5 = inlined_call_operand.vmem [shape: bf16[8,16], index: 5, kind: input, shape index: {}]   ;;  %s1016_s6 = inlined_call_operand.vmem [shape: f32[8,1], index: 6, kind: input, shape index: {}]   ;;  %s1017_s7 = inlined_call_operand.hbm [shape: f32[8,512], index: 7, kind: output, shape index: {}]  }
   0x1   :  { %14 = vsyncpa [#allocation4 + $0x1], 0  ;;  %s868_s24 = smov 0   ;;  %s870_s25 = smov 0  }
   0x2   :  { %s872_s26 = smov 0   ;;  %s874_s27 = smov 0  }
   0x3 LB: > { %s682_s28 = sadd.s32 4294967295, %s824_s27   ;;  %s683_s29 = sadd.s32 4294967294, %s824_s27   ;;  %s824_s27 = sphi %s874_s27, %s1025_s27   ;;  %s820_s26 = sphi %s872_s26, %s1024_s26   ;;  %s816_s25 = sphi %s870_s25, %s1023_s25   ;;  %s812_s24 = sphi %s868_s24, %s1022_s24  }
   0x4   : > { %s891_s30 = sadd.s32 1, %s824_s27   ;;  %s27_s8 = sadd.s32 1, %s820_s26 }
   0x5   : > { %s24_s9 = ssub.s32 %s824_s27, %s891_s30  ;;  %p34_p0 = scmp.ne.s32.totalorder %s820_s26, %s816_s25 }
   0x6   : > { %p25_p1 = scmp.eq.s32.totalorder %s24_s9, 0  ;;  %p35_p2 = scmp.eq.s32.totalorder %s824_s27, 0 }
   0x7   : > { %p190_p3 = scmp.eq.s32.totalorder %s682_s28, 1  ;;  %p195_p4 = scmp.ne.s32.totalorder %s816_s25, %s812_s24 }
   0x8   : > { %s904_s10 = scalar_select %p25_p1, %s820_s26, %s27_s8  }
   0x9   : > { %p36_p5 = por %p35_p2, %p34_p0  ;;  %p906_p6 = por %p190_p3, %p34_p0 }
   0xa   : > { %p196_p7 = scmp.eq.s32.totalorder %s683_s29, 1  ;;  %p1018_p9 = scmp.ge.s32.totalorder %s824_s27, 2 }
   0xc   : > { %p910_p8 = por %p196_p7, %p195_p4  ;;  %230 = sbr.rel (%p1018_p9) target bundleno = 22 (0x16), region = 40 }
  0x11   : > { %233 = sbr.rel (!%p36_p5) target bundleno = 22 (0x16), region = 44  ;;  %s235_s13 = sand.u32 (%p36_p5), 1, %s820_s26  }
  0x12   : > { %s706_s14 = sshll.u32 (%p36_p5), %s824_s27, 3  ;;  %s686_s15 = sshll.u32 (%p36_p5), %s235_s13, 4 }
  0x13   : > { %s240_s18 = scalar_lea.vmem (%p36_p5), %s1010_s0, %s706_s14  ;;  %s237_s19 = scalar_lea.vmem (%p36_p5), [#allocation2], %s686_s15 }
  0x14   : > { %v271_v0 = vld [vmem:[%s240_s18] sm:$0xff] (%p36_p5)  ;;  %v273_v1 = vld [vmem:[%s240_s18 + $0x10] sm:$0xff] (%p36_p5) }
  0x15   : > { %272 = vst [vmem:[%s237_s19] sm:$0xff] (%p36_p5), %v271_v0  ;;  %274 = vst [vmem:[%s237_s19 + $0x8] sm:$0xff] (%p36_p5), %v273_v1 }
  0x16 PF: > { %p689_p10 = scmp.ge.s32.totalorder %s824_s27, 1  ;;  %p279_p11 = scmp.lt.s32.totalorder %s824_s27, 3 }
  0x18   : > { %p280_p12 = pnand %p689_p10, %p279_p11 }
  0x19   : > { %s286_s20 = sand.u32 (!%p280_p12), 1, %s816_s25   ;;  %s707_s19 = sshll.u32 (!%p280_p12), %s682_s28, 8 }
  0x1a   : > { %283 = sbr.rel (%p280_p12) target bundleno = 738 (0x2e2), region = 82  ;;  %s927_s21 = sshll.u32 (!%p280_p12), %s286_s20, 4 }
  0x1b   : > { %s288_s29 = scalar_lea.vmem (!%p280_p12), [#allocation2], %s927_s21  ;;  %s316_s22 = scalar_lea.vmem (!%p280_p12), [#allocation3], %s927_s21 }
  0x1c   : > { %s618_s23 = sshll.u32 (!%p280_p12), %s316_s22, 4  ;;  %s616_s9 = scalar_lea.hbm (!%p280_p12), %s1017_s7, %s707_s19  ;;  %s619_s23 = int_to_ptr.vmem [resolvable:$true] %s618_s23 }
  0x1d   : > { %s604_s13 = scalar_lea.sflag (!%p280_p12), [#allocation4], %s286_s20  ;;  %s764_s14 = scalar_lea.vmem (!%p280_p12), %s619_s23, 256 }
  0x1e   : > { %p765_p13 = scmp.ne.s32.totalorder (!%p280_p12), %s619_s23, %s764_s14  ;;  %s827_s28 = smov (!%p280_p12), [#allocation3]  }
  0x1f   : > { %v826_v2 = vmov 0   ;;  %v328_v3 = vld [vmem:[%s1012_s2 + $0x10] sm:$0xff]  ;;  %v326_v6 = vld [vmem:[%s1012_s2] sm:$0xff]  ;;  %v329_v7 = vld [vmem:[%s1012_s2 + $0x18] sm:$0xff]  ;;  %vm370_vm0 = vcmask 130048   ;;  %vm461_vm1 = vcmask 261120  }
  0x20   : > { %409 = vmatprep.mubr.bf16.mxu0 %v826_v2  ;;  %748 = vset.pattern.permute.xlu0 %v826_v2  ;;  %v750_v4 = vld [vmem:[%s288_s29 + $0x4] ss:$8 sps:$4 sm:$0xff]   ;;  %v752_v5 = vld [vmem:[%s288_s29] ss:$8 sps:$4 sm:$0xff]   ;;  %p766_p0 = pnand %p765_p13, %p906_p6  ;;  %s768_s21 = sshll.u32 %s827_s28, 4  ;;  %s769_s21 = int_to_ptr.vmem [resolvable:$false] %s768_s21 }
  0x21   : > { %749 = vset.pattern.permute.xlu1 %v826_v2  ;;  %497 = vmatprep.mubr.bf16.mxu1 %v826_v2  ;;  %v753_v8 = vld [vmem:[%s1011_s1] sm:$0xff]   ;;  %v327_v9 = vld [vmem:[%s1012_s2 + $0x8] sm:$0xff]  ;;  %s770_s15 = scalar_lea.vmem %s769_s21, 512  ;;  %p771_p2 = scmp.lt.s32.totalorder %s619_s23, %s769_s21 }
  0x22   : > { %342 = vperm.xlu0 %748, %v328_v3   ;;  %391 = vmatprep.subr.bf16.mxu0 %v750_v4  ;;  %v444_v10 = vld [vmem:[%s1014_s4] sm:$0xff]  ;;  %v445_v11 = vld [vmem:[%s1014_s4 + $0x8] sm:$0xff]  ;;  %p767_p1 = pneg %p766_p0  ;;  %p772_p3 = scmp.lt.s32.totalorder %s770_s15, %s764_s14 }
  0x23   : > { %332 = vperm.xlu1 %749, %v326_v6   ;;  %392 = vmatpush1.bf16.msra.mxu0 %v752_v5  ;;  %v515_v12 = vld [vmem:[%s1016_s6] sm:$0xff]  ;;  %v754_v13 = vld [vmem:[%s1011_s1 + $0x8] sm:$0xff]  }
  0x24   : > { %v755_v46 = vld [vmem:[%s1013_s3] sm:$0xff]   ;;  %p773_p4 = por %p772_p3, %p771_p2 }
  0x25   : > { %v512_v63 = vld [vmem:[%s1015_s5] sm:$0xf] }
  0x26   : > { %347 = vperm.xlu0 %748, %v329_v7   ;;  %696 = vmatmul.mubr.msk.bf16.vlgmr.msra.gmra.mxu0 %vm370_vm0, %v753_v8  ;;  %p774_p5 = pnand %p773_p4, %p767_p1 }
  0x27   : > { %337 = vperm.xlu1 %749, %v327_v9   ;;  %419 = vmatprep.mubr.bf16.mxu0 %v826_v2 }
  0x2a   : > { %448 = vperm.xlu0 %748, %v444_v10  }
  0x2b   : > { %453 = vperm.xlu1 %749, %v445_v11  }
  0x2e   : > { %518 = vperm.xlu0 %748, %v515_v12   ;;  %697 = vmatmul.mubr.msk.bf16.gmra.mxu0 %vm370_vm0, %v754_v13 }
  0x9d   : > { %v343_v17 = vpop.permute.xlu0 %342 }
  0x9e   : > { %v333_v18 = vpop.permute.xlu1 %332 }
  0xa1   : > { %v348_v22 = vpop.permute.xlu0 %347 }
  0xa2   : > { %v338_v23 = vpop.permute.xlu1 %337 }
  0xa5   : > { %v449_v49 = vpop.permute.xlu0 %448 }
  0xa6   : > { %v454_v50 = vpop.permute.xlu1 %453 }
  0xa9   : > { %v519_v0 = vpop.permute.xlu0 %518 }
  0xe6   : > { %v411_v14 = vpop.f32.mrf.mxu0 }
  0xe7   : > { %v412_v37 = vadd.f32 %v411_v14, %v333_v18 }
  0xe8   : > { %v413_v15 = vpop.f32.mrf.mxu0 }
  0xe9   : > { %v414_v30 = vadd.f32 %v413_v15, %v333_v18  ;;  %v430_v44 = vmax.f32 %v412_v37, 0.0 }
  0xea   : > { %v415_v16 = vpop.f32.mrf.mxu0 }
  0xeb   : > { %v416_v32 = vadd.f32 %v415_v16, %v338_v23  ;;  %v431_v39 = vmax.f32 %v414_v30, 0.0 }
  0xec   : > { %v417_v19 = vpop.f32.mrf.mxu0 }
  0xed   : > { %v418_v25 = vadd.f32 %v417_v19, %v338_v23  ;;  %v432_v41 = vmax.f32 %v416_v32, 0.0 }
  0xee   : > { %v421_v20 = vpop.f32.mrf.mxu0 }
  0xef   : > { %v422_v28 = vadd.f32 %v421_v20, %v343_v17  ;;  %v433_v34 = vmax.f32 %v418_v25, 0.0  ;;  %v440_v45 = vpack.c.bf16 %v432_v41, %v430_v44 }
  0xf0   : > { %v423_v21 = vpop.f32.mrf.mxu0 }
  0xf1   : > { %v424_v26 = vadd.f32 %v423_v21, %v343_v17  ;;  %v434_v38 = vmax.f32 %v422_v28, 0.0  ;;  %v441_v43 = vpack.c.bf16 %v433_v34, %v431_v39 }
  0xf2   : > { %v425_v24 = vpop.f32.mrf.mxu0 }
  0xf3   : > { %v426_v27 = vadd.f32 %v425_v24, %v348_v22  ;;  %v435_v35 = vmax.f32 %v424_v26, 0.0 }
  0xf4   : > { %v427_v29 = vpop.f32.mrf.mxu0 }
  0xf5   : > { %v428_v31 = vadd.f32 %v427_v29, %v348_v22  ;;  %v436_v33 = vmax.f32 %v426_v27, 0.0 }
  0xf7   : > { %v437_v36 = vmax.f32 %v428_v31, 0.0  ;;  %v442_v42 = vpack.c.bf16 %v436_v33, %v434_v38 }
  0xf9   : > { %v443_v40 = vpack.c.bf16 %v437_v36, %v435_v35 }
  0xfb   : > { %477 = vmatprep.subr.bf16.mxu1 %v443_v40 }
  0xfc   : > { %478 = vmatpush1.bf16.msra.mxu1 %v442_v42 }
  0xfd   : > { %479 = vmatprep.subr.bf16.mxu1 %v441_v43 }
 0x100   : > { %480 = vmatpush1.bf16.msra.mxu1 %v440_v45 }
 0x103   : > { %699 = vmatmul.mubr.msk.bf16.vlgmr.msra.gmra.mxu1 %vm461_vm1, %v755_v46 }
 0x104   : > { %556 = vmatprep.mubr.bf16.mxu1 %v826_v2 }
 0x1c3   : > { %v499_v47 = vpop.f32.mrf.mxu1 }
 0x1c4   : > { %v500_v54 = vadd.f32 %v499_v47, %v449_v49 }
 0x1c5   : > { %v501_v48 = vpop.f32.mrf.mxu1 }
 0x1c6   : > { %v502_v52 = vadd.f32 %v501_v48, %v449_v49  ;;  %v508_v60 = vmax.f32 %v500_v54, 0.0 }
 0x1c7   : > { %v503_v51 = vpop.f32.mrf.mxu1 }
 0x1c8   : > { %v504_v53 = vadd.f32 %v503_v51, %v454_v50  ;;  %v509_v58 = vmax.f32 %v502_v52, 0.0 }
 0x1c9   : > { %v505_v55 = vpop.f32.mrf.mxu1 }
 0x1ca   : > { %v506_v56 = vadd.f32 %v505_v55, %v454_v50  ;;  %v510_v57 = vmax.f32 %v504_v53, 0.0 }
 0x1cc   : > { %v511_v59 = vmax.f32 %v506_v56, 0.0  ;;  %v513_v62 = vpack.c.bf16 %v510_v57, %v508_v60 }
 0x1ce   : > { %v514_v61 = vpack.c.bf16 %v511_v59, %v509_v58 }
 0x1d0   : > { %538 = vmatprep.subr.bf16.mxu1 %v514_v61 }
 0x1d1   : > { %539 = vmatpush1.bf16.msra.mxu1 %v513_v62 }
 0x1d4   : > { %700 = vmatmul.mubr.msk.bf16.vlgmr.msra.gmra.mxu1 %vm370_vm0, %v512_v63 }
 0x294   : > { %v558_v1 = vpop.f32.mrf.mxu1 }
 0x295   : > { %v559_v2 = vadd.f32 %v558_v1, %v519_v0 }
 0x296   : > { %v560_v3 = vpop.f32.mrf.mxu1 }
 0x297   : > { %v565_v4 = vrot.slane %v559_v2, 4  ;;  %v561_v5 = vadd.f32 %v560_v3, %v519_v0 }
 0x298   : > { %v562_v6 = vpop.f32.mrf.mxu1 }
 0x299   : > { %v566_v7 = vmax.f32 %v559_v2, %v565_v4  ;;  %v571_v8 = vrot.slane %v561_v5, 4 }
 0x29a   : > { %v563_v9 = vpop.f32.mrf.mxu1 }
 0x29b   : > { %v567_v10 = vrot.slane %v566_v7, 2  ;;  %v572_v11 = vmax.f32 %v561_v5, %v571_v8 }
 0x29d   : > { %v568_v12 = vmax.f32 %v566_v7, %v567_v10  ;;  %v573_v13 = vrot.slane %v572_v11, 2 }
 0x29f   : > { %v569_v14 = vrot.slane %v568_v12, 1  ;;  %v574_v15 = vmax.f32 %v572_v11, %v573_v13 }
 0x2a1   : > { %v570_v16 = vmax.f32 %v568_v12, %v569_v14  ;;  %v575_v17 = vrot.slane %v574_v15, 1 }
 0x2a3   : > { %v577_v18 = vsub.f32 %v559_v2, %v570_v16  ;;  %v576_v19 = vmax.f32 %v574_v15, %v575_v17 }
 0x2a5   : > { %v579_v20 = vmul.f32 1.442695, %v577_v18  ;;  %v578_v21 = vsub.f32 %v561_v5, %v576_v19 }
 0x2a7   : > { %756 = vpow2.f32 %v579_v20  ;;  %v581_v22 = vmul.f32 1.442695, %v578_v21 }
 0x2a9   : > { %758 = vpow2.f32 %v581_v22 }
 0x2b4   : > { %v757_v23 = vpop.eup %756 }
 0x2b5   : > { %v583_v24 = vrot.slane %v757_v23, 4 }
 0x2b6   : > { %v759_v25 = vpop.eup %758 }
 0x2b7   : > { %v584_v26 = vadd.f32 %v757_v23, %v583_v24  ;;  %v589_v27 = vrot.slane %v759_v25, 4 }
 0x2b9   : > { %v585_v28 = vrot.slane %v584_v26, 2  ;;  %v590_v29 = vadd.f32 %v759_v25, %v589_v27 }
 0x2bb   : > { %v586_v30 = vadd.f32 %v585_v28, %v584_v26  ;;  %v591_v31 = vrot.slane %v590_v29, 2 }
 0x2bd   : > { %v587_v32 = vrot.slane %v586_v30, 1  ;;  %v592_v33 = vadd.f32 %v591_v31, %v590_v29 }
 0x2bf   : > { %v588_v34 = vadd.f32 %v587_v32, %v586_v30  ;;  %v593_v35 = vrot.slane %v592_v33, 1 }
 0x2c1   : > { %760 = vlog2.f32 %v588_v34  ;;  %v594_v36 = vadd.f32 %v593_v35, %v592_v33 }
 0x2c3   : > { %762 = vlog2.f32 %v594_v36 }
 0x2ce   : > { %v761_v37 = vpop.eup %760 }
 0x2cf   : > { %v596_v38 = vmul.f32 0.6931472, %v761_v37 }
 0x2d0   : > { %v763_v39 = vpop.eup %762 }
 0x2d1   : > { %v599_v40 = vsub.f32 %v577_v18, %v596_v38  ;;  %v598_v41 = vmul.f32 0.6931472, %v763_v39 }
 0x2d3   : > { %601 = vst [vmem:[%s316_s22] sm:$0xff] %v599_v40  ;;  %v600_v42 = vsub.f32 %v578_v21, %v598_v41 }
 0x2d5   : > { %602 = vst [vmem:[%s316_s22 + $0x8] sm:$0xff] %v600_v42 }
 0x2d6   : > { %777 = shalt.err (!%p774_p5)
}
 0x2d7   : > { %s778_s16 = scalar_lea.hbm %s616_s9, 256  ;;  %s782_s18 = scalar_lea.hbm %s1017_s7, 512 }
 0x2d8   : > { %p779_p7 = scmp.ne.s32.totalorder %s616_s9, %s778_s16  ;;  %p783_p12 = scmp.lt.s32.totalorder %s616_s9, %s1017_s7 }
 0x2d9   : > { %p784_p13 = scmp.lt.s32.totalorder %s782_s18, %s778_s16 }
 0x2da   : > { %p780_p10 = pnand %p779_p7, %p906_p6 }
 0x2db   : > { %p785_p0 = por %p784_p13, %p783_p12 }
 0x2dc   : > { %p781_p11 = pneg %p780_p10 }
 0x2de   : > { %p786_p9 = pnand %p785_p0, %p781_p11 }
 0x2e0   : > { %789 = shalt.err (!%p786_p9)
}
 0x2e1   : > { %708 = dma.vmem_to_hbm [thread:$0]  (%p906_p6), %s619_s23, 256, %s616_s9, %s604_s13  }
 0x2e2 PF: > { %s630_s29 = sand.u32 1, %s812_s24   ;;  %p1021_p1 = scmp.ge.s32.totalorder %s824_s27, 2 }
 0x2e3   : > { %s631_s8 = scalar_lea.sflag [#allocation4], %s630_s29 }
 0x2e4   : > { %p711_p2 = pnand %p1021_p1, %p910_p8 }
 0x2e6   : > { %p712_p3 = pneg %p711_p2 }
 0x2e8   : > { %807 = dma.done.wait (%p712_p3), %s631_s8, 256  }
 0x2e9   : > { %809 = vsyncadd (%p712_p3), %s631_s8, 4294967040  ;;  %p17_p9 = scmp.ge.s32.totalorder %s891_s30, 4   ;;  %s1022_s24 = smov %s816_s25 }
 0x2ea   : > { %s1023_s25 = smov %s820_s26  ;;  %s1024_s26 = smov %s904_s10 }
 0x2eb   : > { %s1025_s27 = smov %s891_s30  ;;  %19 = sbr.rel (!%p17_p9) target bundleno = 3 (0x3), region = 126 }
 0x2f0   :  { %636 = vsyncpa [#allocation4], 1 }
 0x2f1   :  { %638 = vsyncpa [#allocation4 + $0x1], 1 }

</bundles_post_ra>
